<compile_context>
chip_gen: v6e
topology: v6e:2x2x1
jax: 0.10.0
libtpu: 0.0.40
codegen_flags: <defaults>
</compile_context>

<pallas_src>
import jax
import jax.numpy as jnp
from jax.experimental import pallas as pl
from jax.experimental.pallas import tpu as pltpu

NI = 1
NO = 1

_LANES = 128        # lane tile (fast axis)
_BLOCK_ROWS = 4096  # rows per grid step -> 4096*128*4 B = 2 MiB per block


def affine_sigmoid_kernel(w_ref, b_ref, x_ref, o_ref):
    # w_ref / b_ref: (1,) f32 in SMEM; x_ref / o_ref: (block_rows, 128) f32 in VMEM.
    # Scalar broadcast multiply-add on the VPU, sigmoid on the EUP (no MXU).
    o_ref[...] = jax.nn.sigmoid(x_ref[...] * w_ref[0] + b_ref[0])


def model_forward(x, weight, bias):
    """x: (B, NI) f32; weight: (NO, NI) (PyTorch convention); bias: (NO,)."""
    B = x.shape[0]
    n = B * NI                                   # NI == NO == 1

    w = weight.reshape(1).astype(jnp.float32)    # scalar weight -> SMEM
    b = bias.reshape(1).astype(jnp.float32)      # scalar bias   -> SMEM

    # Lane-dense layout: view the batch as (rows, 128).  Pad only when the
    # flat length is not a multiple of 128 (a pad is a full extra HBM pass,
    # so skip it whenever the layout allows).  Padded lanes compute
    # sigmoid(b), which is finite and discarded below.
    rows = pl.cdiv(n, _LANES)
    n_pad = rows * _LANES
    xf = x.reshape(-1)
    if n_pad != n:
        xf = jnp.pad(xf, (0, n_pad - n))
    xf = xf.reshape(rows, _LANES)

    # Large blocks amortize per-grid-step overhead.  A ragged last row-block
    # (or rows < _BLOCK_ROWS) is clamped by Pallas, so rows never need padding:
    # a block dim either is a multiple of 8 (_BLOCK_ROWS) or equals the full
    # array extent (rows).
    block_rows = rows if rows <= _BLOCK_ROWS else _BLOCK_ROWS
    grid = (pl.cdiv(rows, block_rows),)

    out = pl.pallas_call(
        affine_sigmoid_kernel,
        out_shape=jax.ShapeDtypeStruct((rows, _LANES), jnp.float32),
        grid_spec=pl.GridSpec(
            grid=grid,
            in_specs=[
                pl.BlockSpec(memory_space=pltpu.MemorySpace.SMEM),      # weight
                pl.BlockSpec(memory_space=pltpu.MemorySpace.SMEM),      # bias
                pl.BlockSpec((block_rows, _LANES), lambda i: (i, 0)),   # x tile
            ],
            out_specs=pl.BlockSpec((block_rows, _LANES), lambda i: (i, 0)),
        ),
        # Write the result in place over the (fresh) lane-dense input slab.
        input_output_aliases={2: 0},
        compiler_params=pltpu.CompilerParams(
            dimension_semantics=("parallel",)),     # megacore-shards on v7x
    )(w, b, xf)

    # Restore (B, NO); the slice is only emitted when padding was added.
    res = out.reshape(-1)
    if n_pad != n:
        res = res[:n]
    return res.reshape(B, NO)


if __name__ == "__main__":
    key = jax.random.PRNGKey(0)
    kx, kw, kb = jax.random.split(key, 3)

    # Deterministic parameter init mimicking nn.Linear(NI, NO):
    # uniform(-1/sqrt(NI), 1/sqrt(NI)) for weight and bias.
    bound = 1.0 / (NI ** 0.5)
    weight = jax.random.uniform(kw, (NO, NI), minval=-bound, maxval=bound,
                                dtype=jnp.float32)
    bias = jax.random.uniform(kb, (NO,), minval=-bound, maxval=bound,
                              dtype=jnp.float32)

    fwd = jax.jit(model_forward)

    # B=8: single full-extent block with padding; B=256: no-pad path;
    # B=300: padded + non-multiple-of-8 rows path.
    for B in (8, 256, 300):
        xb = jax.random.normal(jax.random.fold_in(kx, B), (B, NI),
                               dtype=jnp.float32)
        out = jax.block_until_ready(fwd(xb, weight, bias))
        ref = jax.nn.sigmoid(xb @ weight.T + bias)
        assert out.shape == (B, NO)
        assert jnp.allclose(out, ref, atol=1e-5, rtol=1e-5)

    print("KERNEL_OK")
</pallas_src>

<mosaic_0001>
module attributes {stable_mosaic.version = 11 : i64} {
  func.func @affine_sigmoid_kernel(%arg0: i32, %arg1: memref<1xf32, #tpu.memory_space<smem>>, %arg2: memref<1xf32, #tpu.memory_space<smem>>, %arg3: memref<1x128xf32, #tpu.memory_space<vmem>>, %arg4: memref<1x128xf32, #tpu.memory_space<vmem>>) attributes {dimension_semantics = [#tpu.dimension_semantics<parallel>], iteration_bounds = array<i64: 1>, scalar_prefetch = 0 : i64, scratch_operands = 0 : i64, tpu.core_type = #tpu.core_type<tc>, window_params = [{transform_indices = @transform_0, window_bounds = array<i64: 1>}, {transform_indices = @transform_1, window_bounds = array<i64: 1>}, {transform_indices = @transform_2, window_bounds = array<i64: 1, 128>}, {transform_indices = @transform_3, window_bounds = array<i64: 1, 128>}]} {
    %c0 = arith.constant 0 : index
    %c0_0 = arith.constant 0 : index
    %0 = vector.load %arg3[%c0, %c0_0] : memref<1x128xf32, #tpu.memory_space<vmem>>, vector<1x128xf32>
    %c0_1 = arith.constant 0 : index
    %1 = memref.load %arg1[%c0_1] : memref<1xf32, #tpu.memory_space<smem>>
    %2 = vector.broadcast %1 : f32 to vector<1x128xf32>
    %3 = arith.mulf %0, %2 : vector<1x128xf32>
    %c0_2 = arith.constant 0 : index
    %4 = memref.load %arg2[%c0_2] : memref<1xf32, #tpu.memory_space<smem>>
    %5 = vector.broadcast %4 : f32 to vector<1x128xf32>
    %6 = arith.addf %3, %5 : vector<1x128xf32>
    %7 = arith.negf %6 : vector<1x128xf32>
    %8 = math.exp %7 : vector<1x128xf32>
    %cst = arith.constant 1.000000e+00 : f32
    %9 = vector.broadcast %cst : f32 to vector<1x128xf32>
    %10 = arith.addf %9, %8 : vector<1x128xf32>
    %11 = arith.divf %9, %10 : vector<1x128xf32>
    %c0_3 = arith.constant 0 : index
    %c0_4 = arith.constant 0 : index
    %12 = vector.load %arg4[%c0_3, %c0_4] : memref<1x128xf32, #tpu.memory_space<vmem>>, vector<1x128xf32>
    tpu.vector_store %arg4[%c0_3, %c0_4], %11 {strides = array<i32>} : memref<1x128xf32, #tpu.memory_space<vmem>>, vector<1x128xf32>,
    return
  }
  func.func @transform_0(%arg0: i32) -> i32 {
    %c0_i32 = arith.constant 0 : i32
    %c0_i32_0 = arith.constant 0 : i32
    return %c0_i32 : i32
  }
  func.func @transform_1(%arg0: i32) -> i32 {
    %c0_i32 = arith.constant 0 : i32
    %c0_i32_0 = arith.constant 0 : i32
    return %c0_i32 : i32
  }
  func.func @transform_2(%arg0: i32) -> (i32, i32) {
    %c0_i32 = arith.constant 0 : i32
    %c0_i32_0 = arith.constant 0 : i32
    return %arg0, %c0_i32 : i32, i32
  }
  func.func @transform_3(%arg0: i32) -> (i32, i32) {
    %c0_i32 = arith.constant 0 : i32
    %c0_i32_0 = arith.constant 0 : i32
    return %arg0, %c0_i32 : i32, i32
  }
}

</mosaic_0001>

<bundles_post_ra>
// kernel: model_forward.1
= control target key start
LH: loop header
LB: loop body
LE: loop exit
PB: predicated region body
PF: predicated region fallthrough
CT: control target
= control target key end

     0   :  { %s71_s0 = inlined_call_operand.<no memory space> [shape: f32[1], index: 0, kind: input, shape index: {}]   ;;  %s72_s1 = inlined_call_operand.<no memory space> [shape: f32[1], index: 1, kind: input, shape index: {}]   ;;  %s73_s2 = inlined_call_operand.vmem [shape: f32[1,128], index: 2, kind: input, shape index: {}, may-alias: {2,3}]   ;;  %s74_s3 = inlined_call_operand.vmem [shape: f32[1,128], index: 3, kind: output, shape index: {}, may-alias: {2,3}]  }
   0x1   :  { %v16_v0 = vld [vmem:[%s73_s2] sm:$0x1]  ;;  %v18_v1 = vstv %s71_s0  ;;  %v21_v2 = vstv %s72_s1 }
   0x2   :  { %v19_v3 = vmul.f32 %v18_v1, %v16_v0 }
   0x4   :  { %v22_v4 = vadd.f32 %v21_v2, %v19_v3 }
   0x6   :  { %v34_v5 = vmul.f32 -1.442695, %v22_v4 }
   0x8   :  { %35 = vpow2.f32 %v34_v5 }
  0x15   :  { %v36_v6 = vpop.eup %35 }
  0x16   :  { %v26_v7 = vadd.f32 1.0, %v36_v6 }
  0x18   :  { %37 = vrcp.f32 %v26_v7 }
  0x25   :  { %v38_v8 = vpop.eup %37 }
  0x26   :  { %29 = vst [vmem:[%s74_s3] sm:$0x1] %v38_v8 }

</bundles_post_ra>
